<compile_context>
chip_gen: v6e
topology: v6e:2x2x1
jax: 0.10.0
libtpu: 0.0.40
codegen_flags: <defaults>
</compile_context>

<pallas_src>
import math

import jax
import jax.numpy as jnp
from jax.experimental import pallas as pl
from jax.experimental.pallas import tpu as pltpu

_LANES = 128


def _cdiv(a, b):
    return -(-a // b)


def _round_up(a, b):
    return _cdiv(a, b) * b


def _as_2d_f32(x):
    x = x.astype(jnp.float32)
    if x.ndim < 2:
        return x.reshape(1, -1)
    return x.reshape(x.shape[0], -1)


def _make_small_kernel(w_real, w_fake):
    """Single-invocation kernel: both streams fully resident in VMEM."""

    def kernel(xr_ref, xf_ref, out_ref):
        dr = xr_ref[...] - 1.0          # target for the real stream is ones
        df = xf_ref[...]                # target for the fake stream is zeros
        out_ref[0, 0] = (
            jnp.float32(w_real) * jnp.sum(dr * dr)
            + jnp.float32(w_fake) * jnp.sum(df * df)
        )

    return kernel


def _make_tiled_kernel(tiles_real, w_real, w_fake):
    """Row-tiled kernel over a fused (real-rows ++ fake-rows) lane-dense stream.

    tiles_real: number of leading grid steps belonging to the 'real' stream.
    w_real / w_fake: 0.5 / numel for each stream (mean + 0.5 factor folded in).
    """

    def kernel(x_ref, out_ref, acc_ref):
        i = pl.program_id(0)

        @pl.when(i == 0)
        def _init():
            acc_ref[...] = jnp.zeros_like(acc_ref)

        # flag = 1.0 for real tiles (target = ones buffer), 0.0 for fake tiles
        # (target = zeros buffer). Pure scalar arithmetic, no constant tensors
        # read from HBM.
        flag = (i < tiles_real).astype(jnp.float32)
        target = flag
        weight = jnp.float32(w_fake) + (jnp.float32(w_real) - jnp.float32(w_fake)) * flag

        d = x_ref[...] - target
        acc_ref[...] += weight * (d * d)     # VPU-only inner loop

        @pl.when(i == pl.num_programs(0) - 1)
        def _finalize():
            # Single XLU cross-lane/sublane reduce, once at the very end.
            out_ref[0, 0] = jnp.sum(acc_ref[...])

    return kernel


def discriminator_loss(d_x, d_fakes, *, max_block_rows=2048, small_path_max_elems=1 << 18):
    """d_x: (N,1,6,6); d_fakes: (B,1,6,6). Buffers are constants, not inputs."""
    n_real = math.prod(d_x.shape)
    n_fake = math.prod(d_fakes.shape)
    w_real = 0.5 / float(n_real)
    w_fake = 0.5 / float(n_fake)

    if max(n_real, n_fake) <= small_path_max_elems:
        # --- small-input fast path: one invocation, full-array blocks. ---
        xr = _as_2d_f32(d_x)
        xf = _as_2d_f32(d_fakes)
        out = pl.pallas_call(
            _make_small_kernel(w_real, w_fake),
            out_shape=jax.ShapeDtypeStruct((1, 1), jnp.float32),
            in_specs=[
                pl.BlockSpec(memory_space=pltpu.MemorySpace.VMEM),
                pl.BlockSpec(memory_space=pltpu.MemorySpace.VMEM),
            ],
            out_specs=pl.BlockSpec(memory_space=pltpu.MemorySpace.SMEM),
            compiler_params=pltpu.CompilerParams(vmem_limit_bytes=32 * 1024 * 1024),
        )(xr, xf)
        return out[0, 0]

    # --- large-input path: fused lane-dense row-tiled reduction. ---
    rows_needed = _cdiv(max(n_real, n_fake), _LANES)
    block_rows = max(8, min(max_block_rows, _round_up(rows_needed, 8)))
    tile_elems = block_rows * _LANES

    tiles_real = max(1, _cdiv(n_real, tile_elems))
    tiles_fake = max(1, _cdiv(n_fake, tile_elems))
    num_tiles = tiles_real + tiles_fake

    # Flatten to lane-dense layout; pad each stream with its own target value
    # (1.0 for real, 0.0 for fake) so pad elements contribute 0 to the sum.
    xr = d_x.reshape(-1).astype(jnp.float32)
    xr = jnp.pad(xr, (0, tiles_real * tile_elems - n_real), constant_values=1.0)
    xf = d_fakes.reshape(-1).astype(jnp.float32)
    xf = jnp.pad(xf, (0, tiles_fake * tile_elems - n_fake), constant_values=0.0)
    x = jnp.concatenate([xr, xf]).reshape(num_tiles * block_rows, _LANES)

    kernel = _make_tiled_kernel(tiles_real, w_real, w_fake)

    out = pl.pallas_call(
        kernel,
        out_shape=jax.ShapeDtypeStruct((1, 1), jnp.float32),
        grid_spec=pltpu.PrefetchScalarGridSpec(
            num_scalar_prefetch=0,
            grid=(num_tiles,),
            in_specs=[pl.BlockSpec((block_rows, _LANES), lambda i: (i, 0))],
            out_specs=pl.BlockSpec(
                (1, 1), lambda i: (0, 0), memory_space=pltpu.MemorySpace.SMEM
            ),
            scratch_shapes=[pltpu.VMEM((block_rows, _LANES), jnp.float32)],
        ),
        compiler_params=pltpu.CompilerParams(
            dimension_semantics=("arbitrary",),
            vmem_limit_bytes=32 * 1024 * 1024,
        ),
    )(x)
    return out[0, 0]


if __name__ == "__main__":
    def reference(d_x, d_fakes):
        # Same semantics as torch mse_loss (mean over broadcast shape).
        t1 = jnp.ones((1, 1, 6, 6), dtype=jnp.float32)
        t0 = jnp.zeros(d_fakes.shape, dtype=jnp.float32)
        return 0.5 * (jnp.mean((d_x - t1) ** 2) + jnp.mean((d_fakes - t0) ** 2))

    key = jax.random.PRNGKey(0)
    k1, k2, k3, k4 = jax.random.split(key, 4)

    # 1) Default small config (buffer_size=2) -> small-input fast path.
    buffer_size = 2
    d_x = jax.random.normal(k1, (buffer_size, 1, 6, 6), dtype=jnp.float32)
    d_fakes = jax.random.normal(k2, (buffer_size, 1, 6, 6), dtype=jnp.float32)
    loss = jax.block_until_ready(discriminator_loss(d_x, d_fakes))
    ref = reference(d_x, d_fakes)
    assert jnp.allclose(loss, ref, rtol=1e-5, atol=1e-5), (loss, ref)

    # 2) Also exercise the tiled reduction path (forced via threshold=0).
    big = 64
    d_x2 = jax.random.normal(k3, (big, 1, 6, 6), dtype=jnp.float32)
    d_fakes2 = jax.random.normal(k4, (big, 1, 6, 6), dtype=jnp.float32)
    loss2 = jax.block_until_ready(
        discriminator_loss(d_x2, d_fakes2, small_path_max_elems=0)
    )
    ref2 = reference(d_x2, d_fakes2)
    assert jnp.allclose(loss2, ref2, rtol=1e-5, atol=1e-5), (loss2, ref2)

    print("KERNEL_OK")
</pallas_src>

<mosaic_0001>
module attributes {stable_mosaic.version = 11 : i64} {
  func.func @kernel(%arg0: memref<2x36xf32, #tpu.memory_space<vmem>>, %arg1: memref<2x36xf32, #tpu.memory_space<vmem>>, %arg2: memref<1x1xf32, #tpu.memory_space<smem>>) attributes {dimension_semantics = [], scalar_prefetch = 0 : i64, scratch_operands = 0 : i64, tpu.core_type = #tpu.core_type<tc>} {
    %c0 = arith.constant 0 : index
    %c0_0 = arith.constant 0 : index
    %0 = vector.load %arg0[%c0, %c0_0] : memref<2x36xf32, #tpu.memory_space<vmem>>, vector<2x36xf32>
    %cst = arith.constant 1.000000e+00 : f32
    %1 = vector.broadcast %cst : f32 to vector<2x36xf32>
    %2 = arith.subf %0, %1 : vector<2x36xf32>
    %c0_1 = arith.constant 0 : index
    %c0_2 = arith.constant 0 : index
    %3 = vector.load %arg1[%c0_1, %c0_2] : memref<2x36xf32, #tpu.memory_space<vmem>>, vector<2x36xf32>
    %4 = arith.mulf %2, %2 : vector<2x36xf32>
    %5 = vector.shape_cast %4 : vector<2x36xf32> to vector<1x2x36xf32>
    %cst_3 = arith.constant dense<0.000000e+00> : vector<1xf32>
    %6 = vector.multi_reduction <add>, %5, %cst_3 [1, 2] : vector<1x2x36xf32> to vector<1xf32>
    %7 = vector.shape_cast %6 : vector<1xf32> to vector<1x1x1xf32>
    %8 = vector.extract %7[0, 0, 0] : f32 from vector<1x1x1xf32>
    %cst_4 = arith.constant 0.0069444445 : f32
    %9 = arith.mulf %cst_4, %8 : f32
    %10 = arith.mulf %3, %3 : vector<2x36xf32>
    %11 = vector.shape_cast %10 : vector<2x36xf32> to vector<1x2x36xf32>
    %cst_5 = arith.constant dense<0.000000e+00> : vector<1xf32>
    %12 = vector.multi_reduction <add>, %11, %cst_5 [1, 2] : vector<1x2x36xf32> to vector<1xf32>
    %13 = vector.shape_cast %12 : vector<1xf32> to vector<1x1x1xf32>
    %14 = vector.extract %13[0, 0, 0] : f32 from vector<1x1x1xf32>
    %cst_6 = arith.constant 0.0069444445 : f32
    %15 = arith.mulf %cst_6, %14 : f32
    %16 = arith.addf %9, %15 : f32
    %c0_7 = arith.constant 0 : index
    %c0_8 = arith.constant 0 : index
    %17 = memref.load %arg2[%c0_7, %c0_8] : memref<1x1xf32, #tpu.memory_space<smem>>
    memref.store %16, %arg2[%c0_7, %c0_8] : memref<1x1xf32, #tpu.memory_space<smem>>
    return
  }
}

</mosaic_0001>

<bundles_post_ra>
// kernel: tpu_custom_call.1
= control target key start
LH: loop header
LB: loop body
LE: loop exit
PB: predicated region body
PF: predicated region fallthrough
CT: control target
= control target key end

     0   :  { %7 = vsyncpa [#allocation3], 0  ;;  %s171_s0 = inlined_call_operand.hbm [shape: f32[2,36], index: 0, kind: input, shape index: {}]   ;;  %s172_s1 = inlined_call_operand.hbm [shape: f32[2,36], index: 1, kind: input, shape index: {}]   ;;  %s173_s2 = inlined_call_operand.hbm [shape: f32[1,1], index: 2, kind: output, shape index: {}]  }
   0x1   :  { %8 = vsyncpa [#allocation6], 0 }
   0x2   :  { %9 = vsyncpa [#allocation4], 0  ;;  %s144_s9 = smov [#allocation2]   ;;  %s145_s11 = smov [#allocation5]  }
   0x3   :  { %s16_s10 = sshll.u32 %s144_s9, 4  ;;  %s26_s12 = sshll.u32 %s145_s11, 4  ;;  %s17_s10 = int_to_ptr.vmem [resolvable:$true] %s16_s10  ;;  %s27_s12 = int_to_ptr.vmem [resolvable:$true] %s26_s12 }
   0x4   :  { %s98_s13 = scalar_lea.vmem %s17_s10, 32  ;;  %p103_p1 = scmp.lt.s32.totalorder %s17_s10, %s17_s10 }
   0x5   :  { %p99_p0 = scmp.ne.s32.totalorder %s17_s10, %s98_s13  ;;  %p104_p2 = scmp.lt.s32.totalorder %s98_s13, %s98_s13 }
   0x7   :  { %p105_p3 = por %p104_p2, %p103_p1 }
   0x9   :  { %p106_p4 = pnand %p105_p3, %p99_p0 }
   0xb   :  { %109 = shalt.err (!%p106_p4)
}
   0xc   :  { %19 = dma.hbm_to_vmem [thread:$0]  %s171_s0, 32, %s17_s10, [#allocation3]  }
   0xd   :  { %s118_s16 = scalar_lea.vmem %s27_s12, 32  ;;  %p123_p6 = scmp.lt.s32.totalorder %s27_s12, %s27_s12 }
   0xe   :  { %p119_p5 = scmp.ne.s32.totalorder %s27_s12, %s118_s16  ;;  %p124_p7 = scmp.lt.s32.totalorder %s118_s16, %s118_s16 }
  0x10   :  { %p125_p8 = por %p124_p7, %p123_p6 }
  0x12   :  { %p126_p9 = pnand %p125_p8, %p119_p5 }
  0x14   :  { %129 = shalt.err (!%p126_p9)
}
  0x15   :  { %29 = dma.hbm_to_vmem [thread:$0]  %s172_s1, 32, %s27_s12, [#allocation6]  }
  0x16   :  { %138 = dma.done.wait [#allocation3], 32  }
  0x17   :  { %139 = vsyncadd [#allocation3], 4294967264 }
  0x18   :  { %140 = dma.done.wait [#allocation6], 32  }
  0x19   :  { %141 = vsyncadd [#allocation6], 4294967264  ;;  %v36_v0 = vld [vmem:[#allocation2] sm:$0x3]  ;;  %v38_v1 = vld [vmem:[#allocation5] sm:$0x3] }
  0x1a   :  { %v82_v2 = vadd.f32 -1.0, %v36_v0  ;;  %vm40_vm0 = vcmask 287744   ;;  %v52_v4 = vmul.f32 %v38_v1, %v38_v1  ;;  %s146_s22 = smov [#allocation7]  }
  0x1c   :  { %v39_v3 = vmul.f32 %v82_v2, %v82_v2  ;;  %v53_v6 = vsel %vm40_vm0, %v52_v4, 0.0 }
  0x1e   :  { %v41_v5 = vsel %vm40_vm0, %v39_v3, 0.0 }
  0x1f   :  { %42 = vadd.xlane.f32.xlu0 %v41_v5 }
  0x23   :  { %54 = vadd.xlane.f32.xlu0 %v53_v6 }
  0xa8   :  { %v43_v7 = vpop.xlane.xlu0 %42 }
  0xa9   :  { %v44_v8 = vrot.slane %v43_v7, 4 }
  0xab   :  { %v45_v9 = vadd.f32 %v44_v8, %v43_v7 }
  0xac   :  { %v55_v10 = vpop.xlane.xlu0 %54 }
  0xad   :  { %v46_v11 = vrot.slane %v45_v9, 2  ;;  %v56_v12 = vrot.slane %v55_v10, 4 }
  0xaf   :  { %v57_v13 = vadd.f32 %v56_v12, %v55_v10  ;;  %v47_v14 = vadd.f32 %v46_v11, %v45_v9 }
  0xb1   :  { %v58_v15 = vrot.slane %v57_v13, 2  ;;  %v48_v16 = vrot.slane %v47_v14, 1 }
  0xb3   :  { %v59_v17 = vadd.f32 %v58_v15, %v57_v13  ;;  %v49_v18 = vadd.f32 %v48_v16, %v47_v14 }
  0xb5   :  { %83 = vpush %v49_v18  ;;  %v60_v19 = vrot.slane %v59_v17, 1 }
  0xb7   :  { %v61_v20 = vadd.f32 %v60_v19, %v59_v17 }
  0xb9   :  { %85 = vpush %v61_v20 }
  0xe6   :  { %s84_s0 = spop %83 }
  0xe7   :  { %s51_s1 = smul.f32 0.0069444445, %s84_s0 }
  0xea   :  { %s86_s19 = spop %85 }
  0xeb   :  { %s63_s20 = smul.f32 0.0069444445, %s86_s19 }
  0xed   :  { %s64_s21 = sadd.f32 %s63_s20, %s51_s1 }
  0xef   :  { %66 = sst [smem:[#allocation7]] %s64_s21 }
  0xf0   :  { %74 = dma.smem_to_hbm %s146_s22, 16, %s173_s2, [#allocation4]  }
  0xf1   :  { %142 = dma.done.wait [#allocation4], 16  }
  0xf2   :  { %143 = vsyncadd [#allocation4], 4294967280 }
  0xf3   :  { %78 = sfence }
  0xf4   :  { %79 = vsyncpa [#allocation3], 1 }
  0xf5   :  { %80 = vsyncpa [#allocation6], 1 }
  0xf6   :  { %81 = vsyncpa [#allocation4], 1 }

</bundles_post_ra>
